<compile_context>
chip_gen: v7x
topology: tpu7x:2x2x1
jax: 0.10.0
libtpu: 0.0.40
codegen_flags: <defaults>
</compile_context>

<pallas_src>
import jax
import jax.numpy as jnp
from jax.experimental import pallas as pl
from jax.experimental.pallas import tpu as pltpu

LN_EPS = 1e-5


def _round_up(n, m):
    return ((n + m - 1) // m) * m


def _vmem_capacity_bytes():
    # Generation-aware VMEM ceiling; fall back to the smallest (v7x per-TC).
    try:
        return int(pltpu.get_tpu_info().vmem_capacity_bytes)
    except Exception:
        return 64 * 1024 * 1024


def _resident_spec(block_shape, index_map):
    # Grid-invariant operand: fetched once (constant index_map); request
    # single-buffering to halve its VMEM footprint. Fall back gracefully if
    # this JAX version's BlockSpec lacks pipeline_mode.
    try:
        return pl.BlockSpec(block_shape, index_map, pipeline_mode=pl.Buffered(1))
    except TypeError:
        return pl.BlockSpec(block_shape, index_map)


def _skip_ln_kernel(x_ref, w_ref, b_ref, gamma_ref, beta_ref, o_ref):
    # x_ref:     (TM, H) current row-tile (native dtype)
    # w_ref:     (H, H)  linear weight (native / bf16), applied as x @ W
    # b_ref:     (1, H)  linear bias      (f32, pre-cast in wrapper)
    # gamma_ref: (1, H)  LayerNorm scale  (f32)
    # beta_ref:  (1, H)  LayerNorm shift  (f32)
    x = x_ref[...]
    xf = x.astype(jnp.float32)

    # module(x): position-wise linear on the MXU; operands in the weight's
    # dtype, f32 accumulation.
    y = jnp.dot(x.astype(w_ref.dtype), w_ref[...],
                preferred_element_type=jnp.float32)

    # residual add + bias, in f32.
    z = xf + y + b_ref[...]

    # LayerNorm over the hidden dim — two-pass variance (z already in vregs;
    # the extra pass is pure VPU/XLU slack in this HBM-bound kernel).
    mean = jnp.mean(z, axis=-1, keepdims=True)
    d = z - mean
    var = jnp.mean(d * d, axis=-1, keepdims=True)
    zn = d * jax.lax.rsqrt(var + LN_EPS)

    o_ref[...] = (zn * gamma_ref[...] + beta_ref[...]).astype(o_ref.dtype)


def skip_connection_forward(x, w, b, gamma, beta, aux=None, *,
                            target_tile_bytes=2 * 1024 * 1024):
    """out = LayerNorm(x + (x @ w + b)); x: [B, T, H]."""
    del aux  # TODO(synk): aux unused by the concrete wrapped module
    B, T, H = x.shape
    M = B * T
    itemsize = jnp.dtype(x.dtype).itemsize
    # Native sublane packing: 8 rows (f32), 16 (bf16), 32 (int8/fp8).
    sub = max(8, 32 // itemsize)

    # Row tile: ~target_tile_bytes per x tile, sublane-aligned, capped at 4096
    # rows and at the (rounded-up) total row count. No row padding in HBM —
    # the ragged tail tile is handled by Pallas (rows are independent).
    tm = max(sub, target_tile_bytes // max(1, H * itemsize))
    tm = min(4096, tm)
    tm = max(sub, (tm // sub) * sub)
    tm = min(tm, _round_up(M, sub))
    # v7x megacore balance: if everything would fit one tile but there is
    # enough work, split into two so both TensorCores get rows.
    if pl.cdiv(M, tm) == 1 and M >= 4 * sub:
        tm = max(sub, _round_up(pl.cdiv(M, 2), sub))
    grid_m = pl.cdiv(M, tm)

    x2d = x.reshape(M, H)  # no padding of rows or hidden dim

    # MXU operand dtype: native, except large-H f32 where bf16 operands relieve
    # the MXU (flips to MXU-bound earliest on v5e). Residual/LN stays f32.
    mm_dtype = x.dtype
    if x.dtype == jnp.float32 and H >= 1024:
        mm_dtype = jnp.bfloat16
    w_mm = w.astype(mm_dtype)

    # Tiny per-feature params: pre-cast to f32 once in the wrapper.
    b32 = b.astype(jnp.float32)
    g32 = gamma.astype(jnp.float32)
    bt32 = beta.astype(jnp.float32)

    # Generation-aware VMEM budget (v5e/v6e: 128 MiB, v7x: 64 MiB per TC).
    cap = _vmem_capacity_bytes()
    Hl = _round_up(H, 128)  # lane-padded VMEM footprint of one row
    est = (2 * tm * Hl * itemsize                                   # x tiles (double-buffered)
           + 2 * tm * Hl * itemsize                                 # out tiles (double-buffered)
           + _round_up(H, sub) * Hl * jnp.dtype(mm_dtype).itemsize  # weight (single-buffered)
           + 3 * 8 * Hl * 4)                                        # bias / gamma / beta
    vmem_limit = int(min(max(2 * est, 32 * 1024 * 1024),
                         cap - 16 * 1024 * 1024))

    out2d = pl.pallas_call(
        _skip_ln_kernel,
        out_shape=jax.ShapeDtypeStruct((M, H), x.dtype),
        grid_spec=pltpu.PrefetchScalarGridSpec(
            num_scalar_prefetch=0,
            grid=(grid_m,),
            in_specs=[
                pl.BlockSpec((tm, H), lambda i: (i, 0)),      # x row tile (streamed)
                _resident_spec((H, H), lambda i: (0, 0)),     # weight (grid-invariant)
                _resident_spec((1, H), lambda i: (0, 0)),     # bias
                _resident_spec((1, H), lambda i: (0, 0)),     # gamma
                _resident_spec((1, H), lambda i: (0, 0)),     # beta
            ],
            out_specs=pl.BlockSpec((tm, H), lambda i: (i, 0)),
        ),
        compiler_params=pltpu.CompilerParams(
            dimension_semantics=("parallel",),
            vmem_limit_bytes=vmem_limit),
    )(x2d, w_mm, b32, g32, bt32)

    return out2d.reshape(B, T, H)


def reference_forward(x, w, b, gamma, beta):
    y = jnp.einsum("bth,hk->btk", x, w) + b[0]
    z = x + y
    mean = jnp.mean(z, axis=-1, keepdims=True)
    var = jnp.mean((z - mean) ** 2, axis=-1, keepdims=True)
    zn = (z - mean) / jnp.sqrt(var + LN_EPS)
    return zn * gamma[0] + beta[0]


if __name__ == "__main__":
    key = jax.random.PRNGKey(0)
    k_x, k_w, k_b = jax.random.split(key, 3)

    B, T, H = 2, 8, 32

    x = jax.random.normal(k_x, (B, T, H), dtype=jnp.float32)
    # Deterministic parameter init (synthetic, not a checkpoint load).
    w = jax.random.normal(k_w, (H, H), dtype=jnp.float32) * (1.0 / jnp.sqrt(H))
    b = jax.random.normal(k_b, (1, H), dtype=jnp.float32) * 0.01
    gamma = jnp.ones((1, H), dtype=jnp.float32)
    beta = jnp.zeros((1, H), dtype=jnp.float32)

    out = skip_connection_forward(x, w, b, gamma, beta, aux=None)
    out = jax.block_until_ready(out)

    ref = reference_forward(x, w, b, gamma, beta)
    assert out.shape == (B, T, H)
    assert jnp.allclose(out, ref, atol=1e-4, rtol=1e-4), "mismatch vs reference"

    print("KERNEL_OK")
</pallas_src>

<mosaic_0001>
module attributes {stable_mosaic.version = 11 : i64} {
  func.func @_skip_ln_kernel(%arg0: i32, %arg1: memref<16x32xf32, #tpu.memory_space<vmem>>, %arg2: memref<32x32xf32, #tpu.memory_space<vmem>>, %arg3: memref<1x32xf32, #tpu.memory_space<vmem>>, %arg4: memref<1x32xf32, #tpu.memory_space<vmem>>, %arg5: memref<1x32xf32, #tpu.memory_space<vmem>>, %arg6: memref<16x32xf32, #tpu.memory_space<vmem>>) attributes {dimension_semantics = [#tpu.dimension_semantics<parallel>], iteration_bounds = array<i64: 1>, scalar_prefetch = 0 : i64, scratch_operands = 0 : i64, tpu.core_type = #tpu.core_type<tc>, window_params = [{transform_indices = @transform_0, window_bounds = array<i64: 16, 32>}, {pipeline_mode = #tpu.pipeline_mode<synchronous>, transform_indices = @transform_1, window_bounds = array<i64: 32, 32>}, {pipeline_mode = #tpu.pipeline_mode<synchronous>, transform_indices = @transform_2, window_bounds = array<i64: 1, 32>}, {pipeline_mode = #tpu.pipeline_mode<synchronous>, transform_indices = @transform_3, window_bounds = array<i64: 1, 32>}, {pipeline_mode = #tpu.pipeline_mode<synchronous>, transform_indices = @transform_4, window_bounds = array<i64: 1, 32>}, {transform_indices = @transform_5, window_bounds = array<i64: 16, 32>}]} {
    %c0 = arith.constant 0 : index
    %c0_0 = arith.constant 0 : index
    %0 = vector.load %arg1[%c0, %c0_0] : memref<16x32xf32, #tpu.memory_space<vmem>>, vector<16x32xf32>
    %c0_1 = arith.constant 0 : index
    %c0_2 = arith.constant 0 : index
    %1 = vector.load %arg2[%c0_1, %c0_2] : memref<32x32xf32, #tpu.memory_space<vmem>>, vector<32x32xf32>
    %cst = arith.constant dense<0.000000e+00> : vector<16x32xf32>
    %2 = tpu.matmul %0, %1, %cst {dimension_numbers = #tpu.dot_dimension_numbers<[1], [0], [0], [1], [0, 0, 1, 1], [], []>} : vector<16x32xf32>, vector<32x32xf32>, vector<16x32xf32> -> vector<16x32xf32>
    %3 = arith.addf %0, %2 : vector<16x32xf32>
    %c0_3 = arith.constant 0 : index
    %c0_4 = arith.constant 0 : index
    %4 = vector.load %arg3[%c0_3, %c0_4] : memref<1x32xf32, #tpu.memory_space<vmem>>, vector<1x32xf32>
    %5 = vector.broadcast %4 : vector<1x32xf32> to vector<16x32xf32>
    %6 = arith.addf %3, %5 : vector<16x32xf32>
    %cst_5 = arith.constant dense<0.000000e+00> : vector<16xf32>
    %7 = vector.multi_reduction <add>, %6, %cst_5 [1] : vector<16x32xf32> to vector<16xf32>
    %8 = vector.shape_cast %7 : vector<16xf32> to vector<16x1xf32>
    %cst_6 = arith.constant 3.200000e+01 : f32
    %9 = vector.broadcast %cst_6 : f32 to vector<16x1xf32>
    %10 = arith.divf %8, %9 : vector<16x1xf32>
    %11 = vector.broadcast %10 : vector<16x1xf32> to vector<16x32xf32>
    %12 = arith.subf %6, %11 : vector<16x32xf32>
    %13 = arith.mulf %12, %12 : vector<16x32xf32>
    %cst_7 = arith.constant dense<0.000000e+00> : vector<16xf32>
    %14 = vector.multi_reduction <add>, %13, %cst_7 [1] : vector<16x32xf32> to vector<16xf32>
    %15 = vector.shape_cast %14 : vector<16xf32> to vector<16x1xf32>
    %cst_8 = arith.constant 3.200000e+01 : f32
    %16 = vector.broadcast %cst_8 : f32 to vector<16x1xf32>
    %17 = arith.divf %15, %16 : vector<16x1xf32>
    %cst_9 = arith.constant 9.99999974E-6 : f32
    %18 = vector.broadcast %cst_9 : f32 to vector<16x1xf32>
    %19 = arith.addf %17, %18 : vector<16x1xf32>
    %20 = math.rsqrt %19 : vector<16x1xf32>
    %21 = vector.broadcast %20 : vector<16x1xf32> to vector<16x32xf32>
    %22 = arith.mulf %12, %21 : vector<16x32xf32>
    %c0_10 = arith.constant 0 : index
    %c0_11 = arith.constant 0 : index
    %23 = vector.load %arg4[%c0_10, %c0_11] : memref<1x32xf32, #tpu.memory_space<vmem>>, vector<1x32xf32>
    %24 = vector.broadcast %23 : vector<1x32xf32> to vector<16x32xf32>
    %25 = arith.mulf %22, %24 : vector<16x32xf32>
    %c0_12 = arith.constant 0 : index
    %c0_13 = arith.constant 0 : index
    %26 = vector.load %arg5[%c0_12, %c0_13] : memref<1x32xf32, #tpu.memory_space<vmem>>, vector<1x32xf32>
    %27 = vector.broadcast %26 : vector<1x32xf32> to vector<16x32xf32>
    %28 = arith.addf %25, %27 : vector<16x32xf32>
    %c0_14 = arith.constant 0 : index
    %c0_15 = arith.constant 0 : index
    %29 = vector.load %arg6[%c0_14, %c0_15] : memref<16x32xf32, #tpu.memory_space<vmem>>, vector<16x32xf32>
    tpu.vector_store %arg6[%c0_14, %c0_15], %28 {strides = array<i32>} : memref<16x32xf32, #tpu.memory_space<vmem>>, vector<16x32xf32>,
    return
  }
  func.func @transform_0(%arg0: i32) -> (i32, i32) {
    %c0_i32 = arith.constant 0 : i32
    %c0_i32_0 = arith.constant 0 : i32
    return %arg0, %c0_i32 : i32, i32
  }
  func.func @transform_1(%arg0: i32) -> (i32, i32) {
    %c0_i32 = arith.constant 0 : i32
    %c0_i32_0 = arith.constant 0 : i32
    %c0_i32_1 = arith.constant 0 : i32
    return %c0_i32, %c0_i32_0 : i32, i32
  }
  func.func @transform_2(%arg0: i32) -> (i32, i32) {
    %c0_i32 = arith.constant 0 : i32
    %c0_i32_0 = arith.constant 0 : i32
    %c0_i32_1 = arith.constant 0 : i32
    return %c0_i32, %c0_i32_0 : i32, i32
  }
  func.func @transform_3(%arg0: i32) -> (i32, i32) {
    %c0_i32 = arith.constant 0 : i32
    %c0_i32_0 = arith.constant 0 : i32
    %c0_i32_1 = arith.constant 0 : i32
    return %c0_i32, %c0_i32_0 : i32, i32
  }
  func.func @transform_4(%arg0: i32) -> (i32, i32) {
    %c0_i32 = arith.constant 0 : i32
    %c0_i32_0 = arith.constant 0 : i32
    %c0_i32_1 = arith.constant 0 : i32
    return %c0_i32, %c0_i32_0 : i32, i32
  }
  func.func @transform_5(%arg0: i32) -> (i32, i32) {
    %c0_i32 = arith.constant 0 : i32
    %c0_i32_0 = arith.constant 0 : i32
    return %arg0, %c0_i32 : i32, i32
  }
}

</mosaic_0001>

<bundles_post_ra>
// kernel: tpu_custom_call.1
= control target key start
LH: loop header
LB: loop body
LE: loop exit
PB: predicated region body
PF: predicated region fallthrough
CT: control target
= control target key end

     0   :  { %10 = vsyncpa [#allocation3], 0  ;;  %s421_s0 = inlined_call_operand.hbm [shape: f32[16,32], index: 0, kind: input, shape index: {}]   ;;  %s422_s1 = inlined_call_operand.hbm [shape: f32[32,32], index: 1, kind: input, shape index: {}]   ;;  %s423_s2 = inlined_call_operand.vmem [shape: f32[1,32], index: 2, kind: input, shape index: {}]   ;;  %s424_s3 = inlined_call_operand.vmem [shape: f32[1,32], index: 3, kind: input, shape index: {}]   ;;  %s425_s4 = inlined_call_operand.vmem [shape: f32[1,32], index: 4, kind: input, shape index: {}]   ;;  %s426_s5 = inlined_call_operand.hbm [shape: f32[16,32], index: 5, kind: output, shape index: {}]  }
   0x1   :  { %11 = vsyncpa [#allocation6], 0 }
   0x2   :  { %12 = vsyncpa [#allocation4], 0  ;;  %s324_s18 = smov [#allocation2]   ;;  %s252_s22 = scalar_lea.hbm %s421_s0, 256 }
   0x3   :  { %s18_s19 = sshll.u32 %s324_s18, 4  ;;  %p253_p0 = scmp.ne.s32.totalorder %s421_s0, %s252_s22  ;;  %s19_s19 = int_to_ptr.vmem [resolvable:$true] %s18_s19 }
   0x4   :  { %p256_p1 = scmp.lt.u32.totalorder %s252_s22, %s421_s0 }
   0x6   :  { %p258_p2 = pnand %p256_p1, %p253_p0 }
   0x8   :  { %261 = shalt.err (!%p258_p2)
}
   0x9   :  { %s262_s27 = scalar_lea.vmem %s19_s19, 256  ;;  %p267_p4 = scmp.lt.s32.totalorder %s19_s19, %s19_s19 }
   0xa   :  { %p263_p3 = scmp.ne.s32.totalorder %s19_s19, %s262_s27  ;;  %p268_p5 = scmp.lt.s32.totalorder %s262_s27, %s262_s27 }
   0xc   :  { %p269_p6 = por %p268_p5, %p267_p4 }
   0xe   :  { %p270_p7 = pnand %p269_p6, %p263_p3 }
  0x10   :  { %273 = shalt.err (!%p270_p7)
}
  0x11   :  { %s325_s28 = smov 128   ;;  %s326_s29 = smov 8  }
  0x12   :  { %24 = dma.hbm_to_vmem [thread:$0]  %s421_s0, 256, %s19_s19, [#allocation3], %s325_s28, %s325_s28, %s326_s29  }
  0x13   :  { %s327_s7 = smov [#allocation5]   ;;  %s274_s11 = scalar_lea.hbm %s422_s1, 512 }
  0x14   :  { %s30_s8 = sshll.u32 %s327_s7, 4  ;;  %p275_p8 = scmp.ne.s32.totalorder %s422_s1, %s274_s11  ;;  %s31_s8 = int_to_ptr.vmem [resolvable:$true] %s30_s8 }
  0x15   :  { %p278_p9 = scmp.lt.u32.totalorder %s274_s11, %s422_s1 }
  0x17   :  { %p280_p10 = pnand %p278_p9, %p275_p8 }
  0x19   :  { %283 = shalt.err (!%p280_p10)
}
  0x1a   :  { %s284_s16 = scalar_lea.vmem %s31_s8, 512  ;;  %p289_p12 = scmp.lt.s32.totalorder %s31_s8, %s31_s8 }
  0x1b   :  { %p285_p11 = scmp.ne.s32.totalorder %s31_s8, %s284_s16  ;;  %p290_p13 = scmp.lt.s32.totalorder %s284_s16, %s284_s16 }
  0x1d   :  { %p291_p0 = por %p290_p13, %p289_p12 }
  0x1f   :  { %p292_p1 = pnand %p291_p0, %p285_p11 }
  0x21   :  { %295 = shalt.err (!%p292_p1)
}
  0x22   :  { %36 = dma.hbm_to_vmem [thread:$0]  %s422_s1, 512, %s31_s8, [#allocation6], %s325_s28, %s325_s28, %s326_s29  }
  0x23   :  { %318 = dma.done.wait [#allocation3], 256  }
  0x24   :  { %319 = vsyncadd [#allocation3], 4294967040 }
  0x25   :  { %320 = dma.done.wait [#allocation6], 512  }
  0x26   :  { %321 = vsyncadd [#allocation6], 4294966784  ;;  %vm55_vm0 = vcmask 261120   ;;  %v51_v0 = vld [vmem:[#allocation5] sm:$0xff]  ;;  %v52_v1 = vld [vmem:[#allocation5 + $0x8] sm:$0xff]  ;;  %s328_s22 = smov [#allocation7]  }
  0x27   :  { %v53_v2 = vld [vmem:[#allocation5 + $0x10] sm:$0xff]  ;;  %v235_v3 = vpack.c.bf16 %v52_v1, %v51_v0  ;;  %v54_v4 = vld [vmem:[#allocation5 + $0x18] sm:$0xff]  ;;  %s200_s23 = sshll.u32 %s328_s22, 4  ;;  %s201_s23 = int_to_ptr.vmem [resolvable:$true] %s200_s23 }
  0x28   :  { %v49_v5 = vld [vmem:[#allocation2] sm:$0xff]  ;;  %v239_v6 = vpack.c.bf16 %v54_v4, %v53_v2  ;;  %v50_v7 = vld [vmem:[#allocation2 + $0x8] sm:$0xff]  ;;  %s296_s24 = scalar_lea.vmem %s201_s23, 256  ;;  %p301_p3 = scmp.lt.s32.totalorder %s201_s23, %s201_s23 }
  0x29   :  { %232 = vmatprep.mubr.msk.f32.mxu0 %vm55_vm0, %v49_v5  ;;  %236 = vmatprep.subr.bf16.mxu0 %v235_v3  ;;  %v215_v10 = vld [vmem:[%s423_s2] ss:$0 sm:$0xff]  ;;  %p297_p2 = scmp.ne.s32.totalorder %s201_s23, %s296_s24  ;;  %p302_p4 = scmp.lt.s32.totalorder %s296_s24, %s296_s24 }
  0x2a   :  { %238 = vmatpush3.bf16.msra.mxu0 %v235_v3  ;;  %v216_v34 = vld [vmem:[%s424_s3] ss:$0 sm:$0xff] }
  0x2b   :  { %240 = vmatprep.subr.bf16.mxu0 %v239_v6  ;;  %v217_v36 = vld [vmem:[%s425_s4] ss:$0 sm:$0xff]  ;;  %p303_p5 = por %p302_p4, %p301_p3 }
  0x2d   :  { %p304_p6 = pnand %p303_p5, %p297_p2 }
  0x2e   :  { %242 = vmatpush3.bf16.msra.mxu0 %v239_v6 }
  0x31   :  { %233 = vmatmul.mubr.msk.f32.vlgmr.msra.gmra.mrb[0].mxu0 %vm55_vm0, %v50_v7 }
 0x104   :  { %v234_v8 = vpop.f32.mrb[0].mxu0 }
 0x105   :  { %v128_v9 = vpop.f32.mrb[1].mxu0  ;;  %v138_v11 = vadd.f32 %v234_v8, %v50_v7 }
 0x106   :  { %v137_v12 = vadd.f32 %v128_v9, %v49_v5 }
 0x107   :  { %v147_v15 = vadd.f32 %v215_v10, %v138_v11 }
 0x108   :  { %v146_v13 = vadd.f32 %v215_v10, %v137_v12 }
 0x109   :  { %v151_v16 = vsel %vm55_vm0, %v147_v15, 0.0 }
 0x10a   :  { %v148_v14 = vsel %vm55_vm0, %v146_v13, 0.0 }
 0x10b   :  { %149 = vadd.xlane.f32.xlu0 %v148_v14 }
 0x10f   :  { %152 = vadd.xlane.f32.xlu0 %v151_v16 }
 0x198   :  { %v150_v17 = vpop.xlane.xlu0 %149 }
 0x199   :  { %v155_v18 = vmul.f32 0.03125, %v150_v17 }
 0x19b   :  { %v157_v19 = vsub.f32 %v146_v13, %v155_v18 }
 0x19c   :  { %v153_v20 = vpop.xlane.xlu0 %152 }
 0x19d   :  { %v156_v21 = vmul.f32 0.03125, %v153_v20  ;;  %v159_v22 = vmul.f32 %v157_v19, %v157_v19 }
 0x19f   :  { %v158_v23 = vsub.f32 %v147_v15, %v156_v21  ;;  %v161_v24 = vsel %vm55_vm0, %v159_v22, 0.0 }
 0x1a0   :  { %162 = vadd.xlane.f32.xlu1 %v161_v24 }
 0x1a1   :  { %v160_v25 = vmul.f32 %v158_v23, %v158_v23 }
 0x1a3   :  { %v164_v26 = vsel %vm55_vm0, %v160_v25, 0.0 }
 0x1a4   :  { %165 = vadd.xlane.f32.xlu1 %v164_v26 }
 0x22d   :  { %v163_v27 = vpop.xlane.xlu1 %162 }
 0x22e   :  { %v167_v28 = vmul.f32 0.03125, %v163_v27 }
 0x230   :  { %v169_v29 = vadd.f32 1e-05, %v167_v28 }
 0x231   :  { %v166_v30 = vpop.xlane.xlu1 %165 }
 0x232   :  { %248 = vrsqrt.f32 %v169_v29  ;;  %v168_v31 = vmul.f32 0.03125, %v166_v30 }
 0x234   :  { %v170_v32 = vadd.f32 1e-05, %v168_v31 }
 0x236   :  { %250 = vrsqrt.f32 %v170_v32 }
 0x23c   :  { %v249_v33 = vpop.eup %248 }
 0x23d   :  { %v173_v35 = vmul.f32 %v249_v33, %v157_v19 }
 0x23f   :  { %v182_v37 = vmul.f32 %v216_v34, %v173_v35 }
 0x240   :  { %v251_v38 = vpop.eup %250 }
 0x241   :  { %v174_v39 = vmul.f32 %v251_v38, %v158_v23  ;;  %v191_v40 = vadd.f32 %v217_v36, %v182_v37 }
 0x243   :  { %v183_v41 = vmul.f32 %v216_v34, %v174_v39  ;;  %193 = vst.msk [vmem:[#allocation7] sm:$0xff] %vm55_vm0, %v191_v40 }
 0x245   :  { %v192_v42 = vadd.f32 %v217_v36, %v183_v41 }
 0x247   :  { %194 = vst.msk [vmem:[#allocation7 + $0x8] sm:$0xff] %vm55_vm0, %v192_v42 }
 0x248   :  { %307 = shalt.err (!%p304_p6)
}
 0x249   :  { %s308_s25 = scalar_lea.hbm %s426_s5, 256 }
 0x24a   :  { %p309_p7 = scmp.ne.s32.totalorder %s426_s5, %s308_s25  ;;  %p312_p8 = scmp.lt.u32.totalorder %s308_s25, %s426_s5 }
 0x24c   :  { %p314_p9 = pnand %p312_p8, %p309_p7 }
 0x24e   :  { %317 = shalt.err (!%p314_p9)
}
 0x24f   :  { %206 = dma.vmem_to_hbm [thread:$0]  %s201_s23, 256, %s426_s5, [#allocation4], %s325_s28, %s325_s28, %s326_s29  }
 0x250   :  { %322 = dma.done.wait [#allocation4], 256  }
 0x251   :  { %323 = vsyncadd [#allocation4], 4294967040 }
 0x252   :  { %210 = vsyncpa [#allocation3], 1 }
 0x253   :  { %211 = vsyncpa [#allocation6], 1 }
 0x254   :  { %212 = vsyncpa [#allocation4], 1 }

</bundles_post_ra>
